<compile_context>
chip_gen: v7x
topology: tpu7x:2x2x1
jax: 0.10.0
libtpu: 0.0.40
codegen_flags: <defaults>
</compile_context>

<pallas_src>
import jax
import jax.numpy as jnp
from jax.experimental import pallas as pl
from jax.experimental.pallas import tpu as pltpu

# Plain Python float (NOT a jnp scalar) so nothing is captured by the kernel
# trace; it is only used in the wrapper and the reference check.
NEG_FILL = -100000000000.0


def _round_up(x, m):
    return ((x + m - 1) // m) * m


def _vmem_capacity_bytes():
    """Physical VMEM of the current TPU generation (fallback: v7x's 64 MiB)."""
    try:
        return int(pltpu.get_tpu_info().vmem_capacity_bytes)
    except Exception:
        return 64 << 20


def _vmem_step_bytes(tb, d_in, hidden_pad, n_out_pad):
    """Per-grid-step VMEM footprint (double-buffered tiles + resident weights)."""
    x_bytes = 2 * tb * d_in * 4                  # x tile, f32, double-buffered
    out_bytes = 2 * tb * n_out_pad * 4           # out tile, f32, double-buffered
    h_bytes = tb * hidden_pad * (4 + 2)          # f32 hidden + bf16 copy for MXU
    w_bytes = 2 * (d_in * hidden_pad + hidden_pad * n_out_pad) * 2   # bf16 weights
    b_bytes = 4 * (hidden_pad + n_out_pad) * 4   # f32 biases
    return x_bytes + out_bytes + h_bytes + w_bytes + b_bytes


def _choose_batch_tile(batch, d_in, hidden_pad, n_out_pad, vmem_budget):
    """Biggest aligned batch tile that fits the VMEM budget; split into >=2
    grid steps when the batch is large enough (keeps both v7x TensorCores
    busy via dimension_semantics=('parallel',))."""
    per_row = (2 * d_in + 2 * n_out_pad) * 4 + hidden_pad * 6
    fixed = (2 * (d_in * hidden_pad + hidden_pad * n_out_pad) * 2
             + 4 * (hidden_pad + n_out_pad) * 4)
    avail = vmem_budget - fixed
    tb_cap = max(avail // per_row, 8) if avail > 0 else 8

    b_min = _round_up(max(batch, 1), 8)
    if b_min <= tb_cap:
        # Whole (padded) batch fits in one tile: split it so there are at
        # least two grid steps when the batch is big enough.
        if b_min >= 512 and b_min % 512 == 0:
            tb = b_min // 2                      # two 256-aligned halves
        elif b_min >= 16:
            tb = _round_up(pl.cdiv(b_min, 2), 8)
        else:
            tb = b_min                           # tiny batch: single step
    elif tb_cap >= 256:
        tb = (tb_cap // 256) * 256               # biggest MXU-aligned tile
    else:
        tb = max((tb_cap // 8) * 8, 8)
    return int(tb)


def net_forward_kernel(x_ref, w1_ref, b1_ref, w2_ref, b2_ref, out_ref):
    # x_ref:   (TB, D_in)          f32  batch tile of flattened NCHW input
    # w1_ref:  (D_in, H_pad)       bf16 first linear weight   (VMEM-resident)
    # b1_ref:  (1, H_pad)          f32  first linear bias
    # w2_ref:  (H_pad, n_out_pad)  bf16 classifier weight; masked/padded cols zeroed
    # b2_ref:  (1, n_out_pad)      f32  classifier bias; masked/padded cols hold -1e11
    # out_ref: (TB, n_out_pad)     f32  masked logits (lane-dense store)
    x = x_ref[...].astype(jnp.bfloat16)          # free VPU cast (kernel is DMA-bound)
    h = jnp.dot(x, w1_ref[...], preferred_element_type=jnp.float32)
    h = jnp.maximum(h + b1_ref[...], 0.0)
    # Task masking is folded into (w2, b2): zero columns contribute 0 and the
    # bias supplies exactly -1e11, matching torch's .data.fill_(-1e11).
    out_ref[...] = jnp.dot(h.astype(jnp.bfloat16), w2_ref[...],
                           preferred_element_type=jnp.float32) + b2_ref[...]


def net_forward(x_nchw, params, t, nc_per_task, n_outputs):
    """Forward pass of Net: MLP backbone + static task-range masking.

    `t`, `nc_per_task`, `n_outputs` must be static Python ints (the PyTorch
    module itself does `int(t * self.nc_per_task)`); a traced `t` raises here
    instead of silently baking a wrong mask.
    """
    t = int(t)
    nc_per_task = int(nc_per_task)
    n_outputs = int(n_outputs)

    w1, b1, w2, b2 = params
    batch = x_nchw.shape[0]
    d_in, hidden = w1.shape

    offset1 = t * nc_per_task
    offset2 = (t + 1) * nc_per_task

    hidden_pad = _round_up(hidden, 128)
    n_out_pad = _round_up(max(n_outputs, 1), 128)

    # ---- weight prep (one-time, tiny): pad hidden & n_outputs to x128 -------
    w1_p = jnp.pad(w1, ((0, 0), (0, hidden_pad - hidden))).astype(jnp.bfloat16)
    b1_p = jnp.pad(b1.reshape(1, hidden),
                   ((0, 0), (0, hidden_pad - hidden))).astype(jnp.float32)
    w2_p = jnp.pad(w2, ((0, hidden_pad - hidden), (0, n_out_pad - n_outputs)))
    b2_p = jnp.pad(b2.reshape(1, n_outputs),
                   ((0, 0), (0, n_out_pad - n_outputs)))

    # Fold the static task mask into the classifier: columns outside
    # [offset1, offset2) (and lane padding) get zero weights and a -1e11 bias.
    col = jnp.arange(n_out_pad)
    keep = (col >= offset1) & (col < offset2) & (col < n_outputs)
    w2_p = jnp.where(keep[None, :], w2_p, 0.0).astype(jnp.bfloat16)
    b2_p = jnp.where(keep[None, :], b2_p, NEG_FILL).astype(jnp.float32)

    # ---- batch tiling (per-generation VMEM budget, >=2 steps when possible) -
    vmem_cap = _vmem_capacity_bytes()
    tb = _choose_batch_tile(batch, d_in, hidden_pad, n_out_pad,
                            vmem_budget=(vmem_cap * 2) // 5)
    b_pad = _round_up(batch, tb)

    # x stays in its producer dtype (f32): no separate padded-bf16 HBM copy.
    x_flat = x_nchw.reshape(batch, d_in)          # torch-style row-major flatten
    if b_pad != batch:
        x_flat = jnp.pad(x_flat, ((0, b_pad - batch), (0, 0)))

    grid = (b_pad // tb,)

    vmem_need = _vmem_step_bytes(tb, d_in, hidden_pad, n_out_pad)
    vmem_limit = int(min(max(vmem_need * 5 // 4 + (2 << 20), 16 << 20),
                         (vmem_cap * 3) // 4))

    cost = pl.CostEstimate(
        flops=2 * b_pad * (d_in * hidden_pad + hidden_pad * n_out_pad),
        transcendentals=0,
        bytes_accessed=(x_flat.size * 4 + w1_p.size * 2 + w2_p.size * 2
                        + b1_p.size * 4 + b2_p.size * 4 + b_pad * n_out_pad * 4),
    )

    out_pad = pl.pallas_call(
        net_forward_kernel,
        out_shape=jax.ShapeDtypeStruct((b_pad, n_out_pad), jnp.float32),
        grid_spec=pltpu.PrefetchScalarGridSpec(
            num_scalar_prefetch=0,
            grid=grid,
            in_specs=[
                pl.BlockSpec((tb, d_in), lambda i: (i, 0)),              # x: batch-tiled
                pl.BlockSpec((d_in, hidden_pad), lambda i: (0, 0)),      # W1: resident
                pl.BlockSpec((1, hidden_pad), lambda i: (0, 0)),         # b1
                pl.BlockSpec((hidden_pad, n_out_pad), lambda i: (0, 0)), # W2 (mask folded)
                pl.BlockSpec((1, n_out_pad), lambda i: (0, 0)),          # b2 (mask folded)
            ],
            out_specs=pl.BlockSpec((tb, n_out_pad), lambda i: (i, 0)),
        ),
        compiler_params=pltpu.CompilerParams(
            # Batch tiles are independent -> shard grid steps across the two
            # TensorCores on v7x; harmless no-op on single-TC v5e/v6e.
            dimension_semantics=("parallel",),
            vmem_limit_bytes=vmem_limit,
        ),
        cost_estimate=cost,
    )(x_flat, w1_p, b1_p, w2_p, b2_p)

    # Slice off batch padding and lane padding.
    return out_pad[:batch, :n_outputs]


def init_params(key, d_in, hidden, n_out):
    k1, k2, k3, k4 = jax.random.split(key, 4)
    w1 = jax.random.normal(k1, (d_in, hidden), jnp.float32) * 0.02
    b1 = jax.random.normal(k2, (1, hidden), jnp.float32) * 0.02
    w2 = jax.random.normal(k3, (hidden, n_out), jnp.float32) * 0.02
    b2 = jax.random.normal(k4, (1, n_out), jnp.float32) * 0.02
    return (w1, b1, w2, b2)


# TODO(synk): the training-side pieces of Net (CBSR replay buffer, observe(),
# CrossEntropyLoss, SGD step) are host-side control logic, not part of forward.

if __name__ == "__main__":
    # Small shapes consistent with the module: the replay memory stores
    # (3, n_inputs, n_inputs) images, so x is NCHW with C=3.
    B = 2
    n_inputs = 16            # spatial size (H = W = n_inputs)
    n_outputs = 8
    n_tasks = 4
    nc_per_task = n_outputs // n_tasks   # 2
    hidden = 32
    t = 1                    # current task -> valid columns [2, 4)

    key = jax.random.PRNGKey(0)
    kx, kp = jax.random.split(key)
    x = jax.random.normal(kx, (B, 3, n_inputs, n_inputs), jnp.float32)
    params = init_params(kp, 3 * n_inputs * n_inputs, hidden, n_outputs)

    out = net_forward(x, params, t, nc_per_task, n_outputs)
    out = jax.block_until_ready(out)
    assert out.shape == (B, n_outputs)

    # Reference in plain JAX with the same bf16-operand / f32-accumulate math
    # and the same masking semantics as the PyTorch module.
    w1, b1, w2, b2 = params
    xf = x.reshape(B, -1).astype(jnp.bfloat16)
    h_ref = jnp.maximum(
        jnp.dot(xf, w1.astype(jnp.bfloat16), preferred_element_type=jnp.float32) + b1,
        0.0)
    logits_ref = jnp.dot(h_ref.astype(jnp.bfloat16), w2.astype(jnp.bfloat16),
                         preferred_element_type=jnp.float32) + b2
    o1, o2 = t * nc_per_task, (t + 1) * nc_per_task
    ref = logits_ref
    if o1 > 0:
        ref = ref.at[:, :o1].set(NEG_FILL)
    if o2 < n_outputs:
        ref = ref.at[:, o2:].set(NEG_FILL)
    assert jnp.allclose(out, ref, atol=1e-2, rtol=1e-2), "mismatch vs reference"

    print("KERNEL_OK")
</pallas_src>

<mosaic_0001>
module attributes {stable_mosaic.version = 11 : i64} {
  func.func @net_forward_kernel(%arg0: i32, %arg1: memref<8x768xf32, #tpu.memory_space<vmem>>, %arg2: memref<768x128xbf16, #tpu.memory_space<vmem>>, %arg3: memref<1x128xf32, #tpu.memory_space<vmem>>, %arg4: memref<128x128xbf16, #tpu.memory_space<vmem>>, %arg5: memref<1x128xf32, #tpu.memory_space<vmem>>, %arg6: memref<8x128xf32, #tpu.memory_space<vmem>>) attributes {dimension_semantics = [#tpu.dimension_semantics<parallel>], iteration_bounds = array<i64: 1>, scalar_prefetch = 0 : i64, scratch_operands = 0 : i64, tpu.core_type = #tpu.core_type<tc>, window_params = [{transform_indices = @transform_0, window_bounds = array<i64: 8, 768>}, {pipeline_mode = #tpu.pipeline_mode<synchronous>, transform_indices = @transform_1, window_bounds = array<i64: 768, 128>}, {pipeline_mode = #tpu.pipeline_mode<synchronous>, transform_indices = @transform_2, window_bounds = array<i64: 1, 128>}, {pipeline_mode = #tpu.pipeline_mode<synchronous>, transform_indices = @transform_3, window_bounds = array<i64: 128, 128>}, {pipeline_mode = #tpu.pipeline_mode<synchronous>, transform_indices = @transform_4, window_bounds = array<i64: 1, 128>}, {transform_indices = @transform_5, window_bounds = array<i64: 8, 128>}]} {
    %c0 = arith.constant 0 : index
    %c0_0 = arith.constant 0 : index
    %0 = vector.load %arg1[%c0, %c0_0] : memref<8x768xf32, #tpu.memory_space<vmem>>, vector<8x768xf32>
    %1 = arith.truncf %0 : vector<8x768xf32> to vector<8x768xbf16>
    %c0_1 = arith.constant 0 : index
    %c0_2 = arith.constant 0 : index
    %2 = vector.load %arg2[%c0_1, %c0_2] : memref<768x128xbf16, #tpu.memory_space<vmem>>, vector<768x128xbf16>
    %cst = arith.constant dense<0.000000e+00> : vector<8x128xf32>
    %3 = tpu.matmul %1, %2, %cst {dimension_numbers = #tpu.dot_dimension_numbers<[1], [0], [0], [1], [0, 0, 1, 1], [], []>} : vector<8x768xbf16>, vector<768x128xbf16>, vector<8x128xf32> -> vector<8x128xf32>
    %c0_3 = arith.constant 0 : index
    %c0_4 = arith.constant 0 : index
    %4 = vector.load %arg3[%c0_3, %c0_4] : memref<1x128xf32, #tpu.memory_space<vmem>>, vector<1x128xf32>
    %5 = vector.broadcast %4 : vector<1x128xf32> to vector<8x128xf32>
    %6 = arith.addf %3, %5 : vector<8x128xf32>
    %cst_5 = arith.constant 0.000000e+00 : f32
    %7 = vector.broadcast %cst_5 : f32 to vector<8x128xf32>
    %8 = arith.maximumf %6, %7 : vector<8x128xf32>
    %9 = arith.truncf %8 : vector<8x128xf32> to vector<8x128xbf16>
    %c0_6 = arith.constant 0 : index
    %c0_7 = arith.constant 0 : index
    %10 = vector.load %arg4[%c0_6, %c0_7] : memref<128x128xbf16, #tpu.memory_space<vmem>>, vector<128x128xbf16>
    %cst_8 = arith.constant dense<0.000000e+00> : vector<8x128xf32>
    %11 = tpu.matmul %9, %10, %cst_8 {dimension_numbers = #tpu.dot_dimension_numbers<[1], [0], [0], [1], [0, 0, 1, 1], [], []>} : vector<8x128xbf16>, vector<128x128xbf16>, vector<8x128xf32> -> vector<8x128xf32>
    %c0_9 = arith.constant 0 : index
    %c0_10 = arith.constant 0 : index
    %12 = vector.load %arg5[%c0_9, %c0_10] : memref<1x128xf32, #tpu.memory_space<vmem>>, vector<1x128xf32>
    %13 = vector.broadcast %12 : vector<1x128xf32> to vector<8x128xf32>
    %14 = arith.addf %11, %13 : vector<8x128xf32>
    %c0_11 = arith.constant 0 : index
    %c0_12 = arith.constant 0 : index
    %15 = vector.load %arg6[%c0_11, %c0_12] : memref<8x128xf32, #tpu.memory_space<vmem>>, vector<8x128xf32>
    tpu.vector_store %arg6[%c0_11, %c0_12], %14 {strides = array<i32>} : memref<8x128xf32, #tpu.memory_space<vmem>>, vector<8x128xf32>,
    return
  }
  func.func @transform_0(%arg0: i32) -> (i32, i32) {
    %c0_i32 = arith.constant 0 : i32
    %c0_i32_0 = arith.constant 0 : i32
    return %arg0, %c0_i32 : i32, i32
  }
  func.func @transform_1(%arg0: i32) -> (i32, i32) {
    %c0_i32 = arith.constant 0 : i32
    %c0_i32_0 = arith.constant 0 : i32
    %c0_i32_1 = arith.constant 0 : i32
    return %c0_i32, %c0_i32_0 : i32, i32
  }
  func.func @transform_2(%arg0: i32) -> (i32, i32) {
    %c0_i32 = arith.constant 0 : i32
    %c0_i32_0 = arith.constant 0 : i32
    %c0_i32_1 = arith.constant 0 : i32
    return %c0_i32, %c0_i32_0 : i32, i32
  }
  func.func @transform_3(%arg0: i32) -> (i32, i32) {
    %c0_i32 = arith.constant 0 : i32
    %c0_i32_0 = arith.constant 0 : i32
    %c0_i32_1 = arith.constant 0 : i32
    return %c0_i32, %c0_i32_0 : i32, i32
  }
  func.func @transform_4(%arg0: i32) -> (i32, i32) {
    %c0_i32 = arith.constant 0 : i32
    %c0_i32_0 = arith.constant 0 : i32
    %c0_i32_1 = arith.constant 0 : i32
    return %c0_i32, %c0_i32_0 : i32, i32
  }
  func.func @transform_5(%arg0: i32) -> (i32, i32) {
    %c0_i32 = arith.constant 0 : i32
    %c0_i32_0 = arith.constant 0 : i32
    return %arg0, %c0_i32 : i32, i32
  }
}

</mosaic_0001>

<bundles_post_ra>
// kernel: tpu_custom_call.1
= control target key start
LH: loop header
LB: loop body
LE: loop exit
PB: predicated region body
PF: predicated region fallthrough
CT: control target
= control target key end

     0   :  { %10 = vsyncpa [#allocation3], 0  ;;  %s1123_s0 = inlined_call_operand.hbm [shape: f32[8,768], index: 0, kind: input, shape index: {}]   ;;  %s1124_s1 = inlined_call_operand.hbm [shape: bf16[768,128], index: 1, kind: input, shape index: {}]   ;;  %s1125_s2 = inlined_call_operand.vmem [shape: f32[1,128], index: 2, kind: input, shape index: {}]   ;;  %s1126_s3 = inlined_call_operand.hbm [shape: bf16[128,128], index: 3, kind: input, shape index: {}]   ;;  %s1127_s4 = inlined_call_operand.vmem [shape: f32[1,128], index: 4, kind: input, shape index: {}]   ;;  %s1128_s5 = inlined_call_operand.hbm [shape: f32[8,128], index: 5, kind: output, shape index: {}]  }
   0x1   :  { %11 = vsyncpa [#allocation6], 0 }
   0x2   :  { %12 = vsyncpa [#allocation4], 0  ;;  %s1025_s18 = smov [#allocation5]   ;;  %s931_s22 = scalar_lea.hbm %s1124_s1, 6144 }
   0x3   :  { %s28_s19 = sshll.u32 %s1025_s18, 4  ;;  %p932_p0 = scmp.ne.s32.totalorder %s1124_s1, %s931_s22  ;;  %s29_s19 = int_to_ptr.vmem [resolvable:$true] %s28_s19 }
   0x4   :  { %p935_p1 = scmp.lt.u32.totalorder %s931_s22, %s1124_s1 }
   0x6   :  { %p937_p2 = pnand %p935_p1, %p932_p0 }
   0x8   :  { %940 = shalt.err (!%p937_p2)
}
   0x9   :  { %s941_s27 = scalar_lea.vmem %s29_s19, 6144  ;;  %p946_p4 = scmp.lt.s32.totalorder %s29_s19, %s29_s19 }
   0xa   :  { %p942_p3 = scmp.ne.s32.totalorder %s29_s19, %s941_s27  ;;  %p947_p5 = scmp.lt.s32.totalorder %s941_s27, %s941_s27 }
   0xc   :  { %p948_p6 = por %p947_p5, %p946_p4 }
   0xe   :  { %p949_p7 = pnand %p948_p6, %p942_p3 }
  0x10   :  { %952 = shalt.err (!%p949_p7)
}
  0x11   :  { %s1026_s28 = smov 64   ;;  %s1027_s29 = smov 4  }
  0x12   :  { %34 = dma.hbm_to_vmem [thread:$0]  %s1124_s1, 6144, %s29_s19, [#allocation6], %s1026_s28, %s1026_s28, %s1027_s29  }
  0x13   :  { %s1028_s7 = smov [#allocation2]   ;;  %s1029_s9 = smov [#allocation7]  }
  0x14   :  { %s19_s8 = sshll.u32 %s1028_s7, 4  ;;  %s42_s10 = sshll.u32 %s1029_s9, 4  ;;  %s20_s8 = int_to_ptr.vmem [resolvable:$true] %s19_s8  ;;  %s43_s10 = int_to_ptr.vmem [resolvable:$true] %s42_s10 }
  0x15   :  { %s953_s13 = scalar_lea.hbm %s1123_s0, 768 }
  0x16   :  { %p954_p8 = scmp.ne.s32.totalorder %s1123_s0, %s953_s13  ;;  %p957_p9 = scmp.lt.u32.totalorder %s953_s13, %s1123_s0 }
  0x18   :  { %p959_p10 = pnand %p957_p9, %p954_p8 }
  0x1a   :  { %962 = shalt.err (!%p959_p10)
}
  0x1b   :  { %s963_s1 = scalar_lea.vmem %s20_s8, 768  ;;  %p968_p12 = scmp.lt.s32.totalorder %s20_s8, %s20_s8 }
  0x1c   :  { %p964_p11 = scmp.ne.s32.totalorder %s20_s8, %s963_s1  ;;  %p969_p13 = scmp.lt.s32.totalorder %s963_s1, %s963_s1 }
  0x1e   :  { %p970_p0 = por %p969_p13, %p968_p12 }
  0x20   :  { %p971_p1 = pnand %p970_p0, %p964_p11 }
  0x22   :  { %974 = shalt.err (!%p971_p1)
}
  0x23   :  { %22 = dma.hbm_to_vmem [thread:$0]  %s1123_s0, 768, %s20_s8, [#allocation3]  }
  0x24   :  { %s975_s22 = scalar_lea.hbm %s1126_s3, 1024 }
  0x25   :  { %p976_p2 = scmp.ne.s32.totalorder %s1126_s3, %s975_s22  ;;  %p979_p3 = scmp.lt.u32.totalorder %s975_s22, %s1126_s3 }
  0x27   :  { %p981_p4 = pnand %p979_p3, %p976_p2 }
  0x29   :  { %984 = shalt.err (!%p981_p4)
}
  0x2a   :  { %s985_s27 = scalar_lea.vmem %s43_s10, 1024  ;;  %p990_p6 = scmp.lt.s32.totalorder %s43_s10, %s43_s10 }
  0x2b   :  { %p986_p5 = scmp.ne.s32.totalorder %s43_s10, %s985_s27  ;;  %p991_p7 = scmp.lt.s32.totalorder %s985_s27, %s985_s27 }
  0x2d   :  { %p992_p8 = por %p991_p7, %p990_p6 }
  0x2f   :  { %p993_p9 = pnand %p992_p8, %p986_p5 }
  0x31   :  { %996 = shalt.err (!%p993_p9)
}
  0x32   :  { %48 = dma.hbm_to_vmem [thread:$0]  %s1126_s3, 1024, %s43_s10, [#allocation6], %s1026_s28, %s1026_s28, %s1027_s29  }
  0x33   :  { %1019 = dma.done.wait [#allocation3], 768  }
  0x34   :  { %1020 = vsyncadd [#allocation3], 4294966528 }
  0x35   :  { %1021 = dma.done.wait [#allocation6], 7168  }
  0x36   :  { %1022 = vsyncadd [#allocation6], 4294960128  ;;  %v875_v0 = vld [vmem:[#allocation5 + $0x40] sm:$0xff]   ;;  %v879_v4 = vld [vmem:[#allocation5 + $0x48] sm:$0xff]   ;;  %v1030_v61 = vmov 0.0   ;;  %vm1031_vm0 = vmmov 0  }
  0x37   :  { %v876_v1 = vld [vmem:[#allocation5] sm:$0xff]   ;;  %772 = vmatprep.subr.bf16.mxu0 %v875_v0  ;;  %v880_v5 = vld [vmem:[#allocation5 + $0x8] sm:$0xff]   ;;  %v883_v8 = vld [vmem:[#allocation5 + $0x50] sm:$0xff]   ;;  %s1032_s6 = smov [#allocation8]  }
  0x38   :  { %v877_v2 = vld [vmem:[#allocation5 + $0xc0] sm:$0xff]   ;;  %773 = vmatpush3.bf16.msra.mxu0 %v876_v1  ;;  %v881_v6 = vld [vmem:[#allocation5 + $0xc8] sm:$0xff]   ;;  %v884_v9 = vld [vmem:[#allocation5 + $0x10] sm:$0xff]   ;;  %s704_s7 = sshll.u32 %s1032_s6, 4  ;;  %s705_s7 = int_to_ptr.vmem [resolvable:$true] %s704_s7 }
  0x39   :  { %v878_v3 = vld [vmem:[#allocation5 + $0x80] sm:$0xff]   ;;  %794 = vmatprep.subr.bf16.mxu1 %v877_v2  ;;  %774 = vmatprep.subr.bf16.mxu0 %v879_v4  ;;  %v882_v7 = vld [vmem:[#allocation5 + $0x88] sm:$0xff]   ;;  %v885_v10 = vld [vmem:[#allocation5 + $0xd0] sm:$0xff]   ;;  %s997_s8 = scalar_lea.vmem %s705_s7, 128  ;;  %p1002_p11 = scmp.lt.s32.totalorder %s705_s7, %s705_s7 }
  0x3a   :  { %795 = vmatpush3.bf16.msra.mxu1 %v878_v3  ;;  %v886_v11 = vld [vmem:[#allocation5 + $0x90] sm:$0xff]   ;;  %v887_v12 = vld [vmem:[#allocation5 + $0x58] sm:$0xff]   ;;  %v891_v16 = vld [vmem:[#allocation5 + $0x60] sm:$0xff]   ;;  %p998_p10 = scmp.ne.s32.totalorder %s705_s7, %s997_s8  ;;  %p1003_p12 = scmp.lt.s32.totalorder %s997_s8, %s997_s8 }
  0x3b   :  { %796 = vmatprep.subr.bf16.mxu1 %v881_v6  ;;  %v888_v13 = vld [vmem:[#allocation5 + $0x18] sm:$0xff]   ;;  %v892_v17 = vld [vmem:[#allocation5 + $0x20] sm:$0xff]   ;;  %v895_v20 = vld [vmem:[#allocation5 + $0x68] sm:$0xff]  }
  0x3c   :  { %775 = vmatpush3.bf16.msra.mxu0 %v880_v5  ;;  %v889_v14 = vld [vmem:[#allocation5 + $0xd8] sm:$0xff]   ;;  %v893_v18 = vld [vmem:[#allocation5 + $0xe0] sm:$0xff]   ;;  %v896_v21 = vld [vmem:[#allocation5 + $0x28] sm:$0xff]   ;;  %p1004_p13 = por %p1003_p12, %p1002_p11 }
  0x3d   :  { %776 = vmatprep.subr.bf16.mxu0 %v883_v8  ;;  %v890_v15 = vld [vmem:[#allocation5 + $0x98] sm:$0xff]   ;;  %v894_v19 = vld [vmem:[#allocation5 + $0xa0] sm:$0xff]   ;;  %v897_v22 = vld [vmem:[#allocation5 + $0xe8] sm:$0xff]  }
  0x3e   :  { %797 = vmatpush3.bf16.msra.mxu1 %v882_v7  ;;  %v898_v23 = vld [vmem:[#allocation5 + $0xa8] sm:$0xff]   ;;  %v899_v24 = vld [vmem:[#allocation5 + $0x70] sm:$0xff]   ;;  %v903_v28 = vld [vmem:[#allocation5 + $0x78] sm:$0xff]   ;;  %p1005_p0 = pnand %p1004_p13, %p998_p10 }
  0x3f   :  { %798 = vmatprep.subr.bf16.mxu1 %v885_v10  ;;  %v900_v25 = vld [vmem:[#allocation5 + $0x30] sm:$0xff]   ;;  %v904_v29 = vld [vmem:[#allocation5 + $0x38] sm:$0xff]   ;;  %v907_v36 = vld [vmem:[#allocation5 + $0x140] sm:$0xff]  }
  0x40   :  { %777 = vmatpush3.bf16.msra.mxu0 %v884_v9  ;;  %v901_v26 = vld [vmem:[#allocation5 + $0xf0] sm:$0xff]   ;;  %v905_v30 = vld [vmem:[#allocation5 + $0xf8] sm:$0xff]   ;;  %v64_v37 = vld [vmem:[#allocation2 + $0x18] sm:$0xff] }
  0x41   :  { %778 = vmatprep.subr.bf16.mxu0 %v887_v12  ;;  %v902_v27 = vld [vmem:[#allocation5 + $0xb0] sm:$0xff]   ;;  %v62_v31 = vld [vmem:[#allocation2 + $0x8] sm:$0xff]  ;;  %v70_v38 = vpack.c.bf16 %v64_v37, %v64_v37  ;;  %v908_v39 = vld [vmem:[#allocation5 + $0x100] sm:$0xff]  }
  0x42   :  { %799 = vmatpush3.bf16.msra.mxu1 %v886_v11  ;;  %v68_v32 = vpack.c.bf16 %v62_v31, %v62_v31  ;;  %v906_v33 = vld [vmem:[#allocation5 + $0xb8] sm:$0xff]   ;;  %v61_v34 = vld [vmem:[#allocation2] sm:$0xff]  ;;  %v63_v40 = vld [vmem:[#allocation2 + $0x10] sm:$0xff] }
  0x43   :  { %800 = vmatprep.subr.bf16.mxu1 %v889_v14  ;;  %v67_v35 = vpack.c.bf16 %v61_v34, %v61_v34  ;;  %536 = vmatprep.mubr.bf16.mxu1 %v70_v38  ;;  %v69_v41 = vpack.c.bf16 %v63_v40, %v63_v40  ;;  %v909_v42 = vld [vmem:[#allocation5 + $0x148] sm:$0xff]   ;;  %v911_v44 = vld [vmem:[#allocation5 + $0x150] sm:$0xff]   ;;  %v913_v46 = vld [vmem:[#allocation5 + $0x158] sm:$0xff]  }
  0x44   :  { %779 = vmatpush3.bf16.msra.mxu0 %v888_v13  ;;  %496 = vmatprep.mubr.bf16.mxu0 %v68_v32  ;;  %v910_v43 = vld [vmem:[#allocation5 + $0x108] sm:$0xff]   ;;  %v912_v45 = vld [vmem:[#allocation5 + $0x110] sm:$0xff]   ;;  %v914_v47 = vld [vmem:[#allocation5 + $0x118] sm:$0xff]  }
  0x45   :  { %780 = vmatprep.subr.bf16.mxu0 %v891_v16  ;;  %v915_v48 = vld [vmem:[#allocation5 + $0x160] sm:$0xff]   ;;  %v917_v50 = vld [vmem:[#allocation5 + $0x168] sm:$0xff]   ;;  %v66_v51 = vld [vmem:[#allocation2 + $0x28] sm:$0xff] }
  0x46   :  { %801 = vmatpush3.bf16.msra.mxu1 %v890_v15  ;;  %v916_v49 = vld [vmem:[#allocation5 + $0x120] sm:$0xff]   ;;  %v918_v52 = vld [vmem:[#allocation5 + $0x128] sm:$0xff]   ;;  %v72_v53 = vpack.c.bf16 %v66_v51, %v66_v51  ;;  %v919_v54 = vld [vmem:[#allocation5 + $0x170] sm:$0xff]  }
  0x47   :  { %802 = vmatprep.subr.bf16.mxu1 %v893_v18  ;;  %v920_v55 = vld [vmem:[#allocation5 + $0x130] sm:$0xff]   ;;  %v921_v56 = vld [vmem:[#allocation5 + $0x178] sm:$0xff]   ;;  %v923_v60 = vld [vmem:[#allocation7] sm:$0xff]  }
  0x48   :  { %781 = vmatpush3.bf16.msra.mxu0 %v892_v17  ;;  %v922_v57 = vld [vmem:[#allocation5 + $0x138] sm:$0xff]   ;;  %v65_v58 = vld [vmem:[#allocation2 + $0x20] sm:$0xff]  ;;  %v924_v62 = vld [vmem:[#allocation7 + $0x8] sm:$0xff]  }
  0x49   :  { %782 = vmatprep.subr.bf16.mxu0 %v895_v20  ;;  %v71_v59 = vpack.c.bf16 %v65_v58, %v65_v58  ;;  %v925_v63 = vld [vmem:[#allocation7 + $0x10] sm:$0xff]   ;;  %v926_v0 = vld [vmem:[#allocation7 + $0x18] sm:$0xff]   ;;  %v927_v1 = vld [vmem:[#allocation7 + $0x20] sm:$0xff]  }
  0x4a   :  { %803 = vmatpush3.bf16.msra.mxu1 %v894_v19  ;;  %v928_v2 = vld [vmem:[#allocation7 + $0x28] sm:$0xff]   ;;  %v929_v3 = vld [vmem:[#allocation7 + $0x30] sm:$0xff]   ;;  %v930_v4 = vld [vmem:[#allocation7 + $0x38] sm:$0xff]  }
  0x4b   :  { %804 = vmatprep.subr.bf16.mxu1 %v897_v22  ;;  %v714_v6 = vld [vmem:[%s1125_s2] ss:$0 sm:$0xff] }
  0x4c   :  { %783 = vmatpush3.bf16.msra.mxu0 %v896_v21 }
  0x4d   :  { %784 = vmatprep.subr.bf16.mxu0 %v899_v24 }
  0x4e   :  { %805 = vmatpush3.bf16.msra.mxu1 %v898_v23 }
  0x4f   :  { %806 = vmatprep.subr.bf16.mxu1 %v901_v26  ;;  %v763_v26 = vld [vmem:[%s1127_s4] ss:$0 sm:$0xff] }
  0x50   :  { %785 = vmatpush3.bf16.msra.mxu0 %v900_v25 }
  0x51   :  { %786 = vmatprep.subr.bf16.mxu0 %v903_v28 }
  0x52   :  { %807 = vmatpush3.bf16.msra.mxu1 %v902_v27 }
  0x53   :  { %808 = vmatprep.subr.bf16.mxu1 %v905_v30 }
  0x54   :  { %787 = vmatpush3.bf16.msra.mxu0 %v904_v29 }
  0x55   :  { %816 = vmatprep.subr.bf16.mxu0 %v907_v36 }
  0x56   :  { %809 = vmatpush3.bf16.msra.mxu1 %v906_v33 }
  0x57   :  { %497 = vmatmul.mubr.bf16.vlgmr.msra.gmra.mrb[0].mxu0 %v67_v35  ;;  %847 = vmatprep.subr.bf16.mxu1 %v1030_v61 }
  0x58   :  { %817 = vmatpush3.bf16.msra.mxu0 %v908_v39  ;;  %576 = vmatprep.mubr.bf16.mxu0 %v72_v53 }
  0x59   :  { %537 = vmatmul.mubr.bf16.vlgmr.msra.gmra.mrb[0].mxu1 %v69_v41  ;;  %818 = vmatprep.subr.bf16.mxu0 %v909_v42 }
  0x5a   :  { %848 = vmatpush3.bf16.msra.mxu1 %v923_v60  ;;  %863 = vmatprep.mubr.msk.bf16.mxu1 %vm1031_vm0, %v1030_v61 }
  0x5b   :  { %849 = vmatprep.subr.bf16.mxu1 %v1030_v61 }
  0x5c   :  { %819 = vmatpush3.bf16.msra.mxu0 %v910_v43 }
  0x5d   :  { %820 = vmatprep.subr.bf16.mxu0 %v911_v44 }
  0x5e   :  { %850 = vmatpush3.bf16.msra.mxu1 %v924_v62 }
  0x5f   :  { %851 = vmatprep.subr.bf16.mxu1 %v1030_v61 }
  0x60   :  { %821 = vmatpush3.bf16.msra.mxu0 %v912_v45 }
  0x61   :  { %822 = vmatprep.subr.bf16.mxu0 %v913_v46 }
  0x62   :  { %852 = vmatpush3.bf16.msra.mxu1 %v925_v63 }
  0x63   :  { %853 = vmatprep.subr.bf16.mxu1 %v1030_v61 }
  0x64   :  { %823 = vmatpush3.bf16.msra.mxu0 %v914_v47 }
  0x65   :  { %824 = vmatprep.subr.bf16.mxu0 %v915_v48 }
  0x66   :  { %854 = vmatpush3.bf16.msra.mxu1 %v926_v0 }
  0x67   :  { %855 = vmatprep.subr.bf16.mxu1 %v1030_v61 }
  0x68   :  { %825 = vmatpush3.bf16.msra.mxu0 %v916_v49 }
  0x69   :  { %826 = vmatprep.subr.bf16.mxu0 %v917_v50 }
  0x6a   :  { %856 = vmatpush3.bf16.msra.mxu1 %v927_v1 }
  0x6b   :  { %857 = vmatprep.subr.bf16.mxu1 %v1030_v61 }
  0x6c   :  { %827 = vmatpush3.bf16.msra.mxu0 %v918_v52 }
  0x6d   :  { %828 = vmatprep.subr.bf16.mxu0 %v919_v54 }
  0x6e   :  { %858 = vmatpush3.bf16.msra.mxu1 %v928_v2 }
  0x6f   :  { %859 = vmatprep.subr.bf16.mxu1 %v1030_v61 }
  0x70   :  { %829 = vmatpush3.bf16.msra.mxu0 %v920_v55 }
  0x71   :  { %830 = vmatprep.subr.bf16.mxu0 %v921_v56 }
  0x72   :  { %860 = vmatpush3.bf16.msra.mxu1 %v929_v3 }
  0x73   :  { %861 = vmatprep.subr.bf16.mxu1 %v1030_v61 }
  0x74   :  { %831 = vmatpush3.bf16.msra.mxu0 %v922_v57 }
  0x76   :  { %862 = vmatpush3.bf16.msra.mxu1 %v930_v4 }
  0x77   :  { %577 = vmatmul.mubr.bf16.vlgmr.msra.gmra.mrb[4].mxu0 %v71_v59 }
 0x12a   :  { %v788_v5 = vpop.f32.mrb[0].mxu0 }
 0x12b   :  { %v789_v7 = vpop.f32.mrb[1].mxu0 }
 0x12c   :  { %v790_v8 = vadd.f32 %v789_v7, %v788_v5  ;;  %v791_v9 = vpop.f32.mrb[2].mxu0  ;;  %v810_v10 = vpop.f32.mrb[0].mxu1 }
 0x12d   :  { %v792_v11 = vpop.f32.mrb[3].mxu0  ;;  %v811_v13 = vpop.f32.mrb[1].mxu1 }
 0x12e   :  { %v499_v12 = vadd.f32 %v790_v8, %v714_v6  ;;  %v812_v14 = vadd.f32 %v811_v13, %v810_v10  ;;  %v813_v15 = vpop.f32.mrb[2].mxu1 }
 0x12f   :  { %v814_v16 = vpop.f32.mrb[3].mxu1 }
 0x130   :  { %v539_v17 = vadd.f32 %v812_v14, %v499_v12 }
 0x14a   :  { %v832_v18 = vpop.f32.mrb[4].mxu0 }
 0x14b   :  { %v833_v19 = vpop.f32.mrb[5].mxu0 }
 0x14c   :  { %v834_v20 = vadd.f32 %v833_v19, %v832_v18  ;;  %v835_v21 = vpop.f32.mrb[6].mxu0 }
 0x14d   :  { %v836_v22 = vpop.f32.mrb[7].mxu0 }
 0x14e   :  { %v579_v23 = vadd.f32 %v834_v20, %v539_v17 }
 0x150   :  { %v584_v24 = vmax.f32 %v579_v23, 0.0 }
 0x152   :  { %v585_v25 = vpack.c.bf16 %v584_v24, %v584_v24 }
 0x154   :  { %864 = vmatmul.mubr.bf16.vlgmr.msra.gmra.mrb[4].mxu1 %v585_v25 }
 0x227   :  { %v691_v27 = vpop.f32.mrb[4].mxu1 }
 0x228   :  { %v692_v28 = vadd.f32 %v763_v26, %v691_v27  ;;  %v865_v29 = vpop.f32.mrb[5].mxu1 }
 0x229   :  { %v694_v30 = vpop.f32.mrb[6].mxu1 }
 0x22a   :  { %697 = vst [vmem:[#allocation8] sm:$0xff] %v692_v28  ;;  %v866_v31 = vpop.f32.mrb[7].mxu1 }
 0x22b   :  { %1008 = shalt.err (!%p1005_p0)
}
 0x22c   :  { %s1009_s4 = scalar_lea.hbm %s1128_s5, 128 }
 0x22d   :  { %p1010_p1 = scmp.ne.s32.totalorder %s1128_s5, %s1009_s4  ;;  %p1013_p2 = scmp.lt.u32.totalorder %s1009_s4, %s1128_s5 }
 0x22f   :  { %p1015_p3 = pnand %p1013_p2, %p1010_p1 }
 0x231   :  { %1018 = shalt.err (!%p1015_p3)
}
 0x232   :  { %707 = dma.vmem_to_hbm [thread:$0]  %s705_s7, 128, %s1128_s5, [#allocation4]  }
 0x233   :  { %1023 = dma.done.wait [#allocation4], 128  }
 0x234   :  { %1024 = vsyncadd [#allocation4], 4294967168 }
 0x235   :  { %711 = vsyncpa [#allocation3], 1 }
 0x236   :  { %712 = vsyncpa [#allocation6], 1 }
 0x237   :  { %713 = vsyncpa [#allocation4], 1 }

</bundles_post_ra>
